<compile_context>
chip_gen: v6e
topology: v6e:2x2x1
jax: 0.10.0
libtpu: 0.0.40
codegen_flags: <defaults>
</compile_context>

<pallas_src>
import jax
import jax.numpy as jnp
from jax.experimental import pallas as pl
from jax.experimental.pallas import tpu as pltpu


def _round_up(x, m):
    return pl.cdiv(x, m) * m


def _pick_tile(size, max_tile, align=128):
    """Pick a lane-aligned tile and the padded extent it evenly divides."""
    t = min(max_tile, _round_up(size, align))
    return t, _round_up(size, t)


# ----------------------------------------------------------------------------
# Kernel 1: MeanVFE  (dense (8,128) tiling: P on sublanes, voxel axis N on lanes)
#   x_ref   : (C, P, tN)  f32   zero-padded beyond valid points (OpenCOOD convention)
#   inv_ref : (1, tN)     f32   precomputed 1 / max(num_points, 1)
#   out_ref : (C, tN)     f32   mean over valid points
# ----------------------------------------------------------------------------
def mean_vfe_kernel(x_ref, inv_ref, out_ref):
    s = jnp.sum(x_ref[...], axis=1)          # (C, tN) sublane reduction -> idle XLU
    out_ref[...] = s * inv_ref[...]          # multiply-only epilogue (no divides)


def mean_vfe(voxel_features, voxel_num_points, *, max_tn=8192):
    # Precondition: rows beyond voxel_num_points are exactly zero (OpenCOOD padding).
    N, P, C = voxel_features.shape

    # TODO(synk): ideally the voxelizer emits the (C, P, N) layout directly (or the raw
    # array is consumed via a manual transposing DMA); the OpenCOOD input contract is
    # (N, P, C), so one XLA transpose pass remains here.
    x_t = jnp.transpose(voxel_features, (2, 1, 0)).astype(jnp.float32)       # (C, P, N)
    # Reciprocal computed host-side, fused with the int->float cast (tiny pass).
    inv_n = (1.0 / jnp.maximum(voxel_num_points.astype(jnp.float32), 1.0)).reshape(1, N)

    tn, n_pad = _pick_tile(N, max_tn)
    if n_pad != N:
        x_t = jnp.pad(x_t, ((0, 0), (0, 0), (0, n_pad - N)))
        inv_n = jnp.pad(inv_n, ((0, 0), (0, n_pad - N)), constant_values=1.0)

    out_t = pl.pallas_call(
        mean_vfe_kernel,
        out_shape=jax.ShapeDtypeStruct((C, n_pad), jnp.float32),
        grid_spec=pltpu.PrefetchScalarGridSpec(
            num_scalar_prefetch=0,
            grid=(n_pad // tn,),
            in_specs=[
                pl.BlockSpec((C, P, tn), lambda i: (0, 0, i)),
                pl.BlockSpec((1, tn), lambda i: (0, i)),
            ],
            out_specs=pl.BlockSpec((C, tn), lambda i: (0, i)),
        ),
        compiler_params=pltpu.CompilerParams(
            dimension_semantics=("parallel",),
            vmem_limit_bytes=32 * 1024 * 1024,
        ),
    )(x_t, inv_n)

    # Small (C, N) -> (N, C) at the end; writing (N, C) directly from the kernel would
    # require an in-kernel transpose and costs more than this tiny host pass.
    return out_t[:, :N].T


# ----------------------------------------------------------------------------
# Kernel 2: fused 1x1 conv heads (cls_head ++ reg_head), pixel axis on lanes
#   x_ref : (Cin, tM)  f32 (producer dtype) -> cast to bf16 in-kernel
#   w_ref : (O,   Cin) bf16   fused weight, O = O_cls + O_reg
#   b_ref : (O,   1)   f32    fused bias
#   o_ref : (O,   tM)  f32    lane-dense output tile (unmasked stores)
# ----------------------------------------------------------------------------
def heads_kernel(x_ref, w_ref, b_ref, o_ref):
    # Cast the activations to bf16 on the (idle) VPU: halves the MXU feed width with no
    # extra HBM pass (the old wrapper-side cast re-read/re-wrote the whole feature map).
    x_bf = x_ref[...].astype(jnp.bfloat16)
    y = jnp.dot(w_ref[...], x_bf, preferred_element_type=jnp.float32)   # (O, tM)
    o_ref[...] = y + b_ref[...]
    # NOTE: downstream elementwise work (sigmoid on psm, box decode scaling, ...) could
    # be fused here for free; not done to keep the module's forward semantics unchanged.


def conv1x1_heads_fused(x_nchw, w_all, b_all, o_cls, *, max_tm=2048):
    B, Cin, H, W = x_nchw.shape
    O = w_all.shape[0]
    HW = H * W

    # NCHW -> (B, Cin, H*W) is a free reshape; NO dtype cast here (done in-kernel).
    x = x_nchw.reshape(B, Cin, HW)

    if B == 1 and HW > 2 * 128:
        # Keep at least 2 parallel grid steps so both v7x TensorCores get work.
        max_tm = min(max_tm, _round_up(pl.cdiv(HW, 2), 128))
    tm, hw_pad = _pick_tile(HW, max_tm)
    if hw_pad != HW:
        x = jnp.pad(x, ((0, 0), (0, 0), (0, hw_pad - HW)))

    out = pl.pallas_call(
        heads_kernel,
        out_shape=jax.ShapeDtypeStruct((B, O, hw_pad), jnp.float32),
        grid_spec=pltpu.PrefetchScalarGridSpec(
            num_scalar_prefetch=0,
            grid=(B, hw_pad // tm),
            in_specs=[
                pl.BlockSpec((None, Cin, tm), lambda b, j: (b, 0, j)),
                pl.BlockSpec((O, Cin), lambda b, j: (0, 0)),
                pl.BlockSpec((O, 1), lambda b, j: (0, 0)),
            ],
            out_specs=pl.BlockSpec((None, O, tm), lambda b, j: (b, 0, j)),
        ),
        compiler_params=pltpu.CompilerParams(
            dimension_semantics=("parallel", "parallel"),
            # x double-buffer at tm=2048 f32 is ~8 MiB; 32 MiB is safe on v5e/v6e/v7x
            # and leaves headroom up to tm~4096.
            vmem_limit_bytes=32 * 1024 * 1024,
        ),
    )(x, w_all, b_all)

    out = out[:, :, :HW].reshape(B, O, H, W)
    return out[:, :o_cls], out[:, o_cls:]      # psm, rm (NCHW)


# ----------------------------------------------------------------------------
# Module wrapper (parameters initialized deterministically in-script)
# ----------------------------------------------------------------------------
class SecondIntermediatePallas:
    def __init__(self, args, key):
        num_class = args["num_class"]
        anchor_number = args["anchor_number"]
        anchor_num = args["anchor_num"]
        # These formulas follow the provided SecondIntermediate literally:
        #   cls_head = Conv2d(256*2, anchor_number * num_class * num_class, 1)
        #   reg_head = Conv2d(256*2, 7 * anchor_num * num_class, 1)
        cin = 256 * 2
        self.o_cls = anchor_number * num_class * num_class
        self.o_reg = 7 * anchor_num * num_class

        k1, k2, k3, k4 = jax.random.split(key, 4)
        scale = 1.0 / jnp.sqrt(cin)
        # torch Conv2d weight is (O, Cin, 1, 1); stored squeezed as (O, Cin).
        self.w_cls = jax.random.uniform(k1, (self.o_cls, cin), jnp.float32, -scale, scale)
        self.b_cls = jax.random.uniform(k2, (self.o_cls,), jnp.float32, -scale, scale)
        self.w_reg = jax.random.uniform(k3, (self.o_reg, cin), jnp.float32, -scale, scale)
        self.b_reg = jax.random.uniform(k4, (self.o_reg,), jnp.float32, -scale, scale)

        # Fused head parameters: weights in bf16 (MXU input, inference precision),
        # bias in f32 (added to the f32 accumulator).
        self.w_all = jnp.concatenate([self.w_cls, self.w_reg], axis=0).astype(jnp.bfloat16)
        self.b_all = jnp.concatenate([self.b_cls, self.b_reg], axis=0).reshape(-1, 1)

    def forward(self, data_dict):
        vf = data_dict["processed_lidar"]["voxel_features"]
        vnp = data_dict["processed_lidar"]["voxel_num_points"]

        # MeanVFE (Pallas kernel, lane-dense on the voxel axis, dense (8,128) tiles)
        points_mean = mean_vfe(vf, vnp)

        # TODO(synk): VoxelResBackBone8x / HeightCompression / AttBEVBackbone not translated;
        # consume the spatial_features_2d the heads would see in the real pipeline.
        spatial_features_2d = data_dict["spatial_features_2d"]

        psm, rm = conv1x1_heads_fused(
            spatial_features_2d, self.w_all, self.b_all, self.o_cls
        )
        return {"psm": psm, "rm": rm, "points_mean": points_mean}


if __name__ == "__main__":
    key = jax.random.PRNGKey(0)
    k_vf, k_np, k_sf, k_params = jax.random.split(key, 4)

    args = {"num_class": 1, "anchor_number": 2, "anchor_num": 2}

    # Synthetic voxel inputs: N=128 voxels, P=8 points/voxel, 4 features.
    N, P, C = 128, 8, 4
    voxel_num_points = jax.random.randint(k_np, (N,), 1, P + 1).astype(jnp.int32)
    raw = jax.random.normal(k_vf, (N, P, C), jnp.float32)
    valid = (jnp.arange(P)[None, :, None] < voxel_num_points[:, None, None]).astype(
        jnp.float32
    )
    voxel_features = raw * valid  # zero-padded beyond valid points (as in OpenCOOD)

    # Synthetic BEV features feeding the heads: (B=2, C=512, H=16, W=16), NCHW, f32.
    B, Cin, H, W = 2, 512, 16, 16
    spatial_features_2d = jax.random.normal(k_sf, (B, Cin, H, W), jnp.float32)

    model = SecondIntermediatePallas(args, k_params)
    data_dict = {
        "processed_lidar": {
            "voxel_features": voxel_features,
            "voxel_coords": jnp.zeros((N, 4), jnp.int32),
            "voxel_num_points": voxel_num_points,
        },
        "record_len": jnp.array([1, 1], jnp.int32),
        "spatial_features_2d": spatial_features_2d,
    }

    out = model.forward(data_dict)
    jax.block_until_ready(out)

    # --- Reference checks in plain JAX ---------------------------------------
    ref_mean = voxel_features.sum(axis=1) / jnp.maximum(
        voxel_num_points.astype(jnp.float32)[:, None], 1.0
    )

    # Heads reference: same bf16-quantized weights/activations, f32 accumulation.
    # (bf16 is an explicit inference-precision choice; fp32-exact parity with the
    # PyTorch module is not expected at ~1e-2 relative.)
    x_flat = (
        spatial_features_2d.reshape(B, Cin, H * W)
        .astype(jnp.bfloat16)
        .astype(jnp.float32)
    )
    w_f32 = model.w_all.astype(jnp.float32)
    ref_all = (
        jnp.einsum("oc,bcm->bom", w_f32, x_flat,
                   precision=jax.lax.Precision.HIGHEST)
        + model.b_all[None]
    ).reshape(B, -1, H, W)
    ref_psm = ref_all[:, : model.o_cls]
    ref_rm = ref_all[:, model.o_cls:]

    assert out["psm"].shape == (B, 2, H, W)
    assert out["rm"].shape == (B, 14, H, W)
    assert jnp.allclose(out["points_mean"], ref_mean, atol=1e-5)
    assert jnp.allclose(out["psm"], ref_psm, atol=1e-3, rtol=1e-3)
    assert jnp.allclose(out["rm"], ref_rm, atol=1e-3, rtol=1e-3)

    print("KERNEL_OK")
</pallas_src>

<mosaic_0001>
module attributes {stable_mosaic.version = 11 : i64} {
  func.func @mean_vfe_kernel(%arg0: i32, %arg1: memref<4x8x128xf32, #tpu.memory_space<vmem>>, %arg2: memref<1x128xf32, #tpu.memory_space<vmem>>, %arg3: memref<4x128xf32, #tpu.memory_space<vmem>>) attributes {dimension_semantics = [#tpu.dimension_semantics<parallel>], iteration_bounds = array<i64: 1>, scalar_prefetch = 0 : i64, scratch_operands = 0 : i64, tpu.core_type = #tpu.core_type<tc>, window_params = [{transform_indices = @transform_0, window_bounds = array<i64: 4, 8, 128>}, {transform_indices = @transform_1, window_bounds = array<i64: 1, 128>}, {transform_indices = @transform_2, window_bounds = array<i64: 4, 128>}]} {
    %c0 = arith.constant 0 : index
    %c0_0 = arith.constant 0 : index
    %c0_1 = arith.constant 0 : index
    %0 = vector.load %arg1[%c0, %c0_0, %c0_1] : memref<4x8x128xf32, #tpu.memory_space<vmem>>, vector<4x8x128xf32>
    %cst = arith.constant dense<0.000000e+00> : vector<4x128xf32>
    %1 = vector.multi_reduction <add>, %0, %cst [1] : vector<4x8x128xf32> to vector<4x128xf32>
    %c0_2 = arith.constant 0 : index
    %c0_3 = arith.constant 0 : index
    %2 = vector.load %arg2[%c0_2, %c0_3] : memref<1x128xf32, #tpu.memory_space<vmem>>, vector<1x128xf32>
    %3 = vector.broadcast %2 : vector<1x128xf32> to vector<4x128xf32>
    %4 = arith.mulf %1, %3 : vector<4x128xf32>
    %c0_4 = arith.constant 0 : index
    %c0_5 = arith.constant 0 : index
    %5 = vector.load %arg3[%c0_4, %c0_5] : memref<4x128xf32, #tpu.memory_space<vmem>>, vector<4x128xf32>
    tpu.vector_store %arg3[%c0_4, %c0_5], %4 {strides = array<i32>} : memref<4x128xf32, #tpu.memory_space<vmem>>, vector<4x128xf32>,
    return
  }
  func.func @transform_0(%arg0: i32) -> (i32, i32, i32) {
    %c0_i32 = arith.constant 0 : i32
    %c0_i32_0 = arith.constant 0 : i32
    %c0_i32_1 = arith.constant 0 : i32
    return %c0_i32, %c0_i32_0, %arg0 : i32, i32, i32
  }
  func.func @transform_1(%arg0: i32) -> (i32, i32) {
    %c0_i32 = arith.constant 0 : i32
    %c0_i32_0 = arith.constant 0 : i32
    return %c0_i32, %arg0 : i32, i32
  }
  func.func @transform_2(%arg0: i32) -> (i32, i32) {
    %c0_i32 = arith.constant 0 : i32
    %c0_i32_0 = arith.constant 0 : i32
    return %c0_i32, %arg0 : i32, i32
  }
}

</mosaic_0001>

<bundles_post_ra>
// kernel: tpu_custom_call.1
= control target key start
LH: loop header
LB: loop body
LE: loop exit
PB: predicated region body
PF: predicated region fallthrough
CT: control target
= control target key end

     0   :  { %7 = vsyncpa [#allocation3], 0  ;;  %s172_s0 = inlined_call_operand.hbm [shape: f32[4,8,128], index: 0, kind: input, shape index: {}]   ;;  %s173_s1 = inlined_call_operand.vmem [shape: f32[1,128], index: 1, kind: input, shape index: {}]   ;;  %s174_s2 = inlined_call_operand.hbm [shape: f32[4,128], index: 2, kind: output, shape index: {}]  }
   0x1   :  { %8 = vsyncpa [#allocation4], 0  ;;  %s144_s9 = smov [#allocation2]  }
   0x2   :  { %s14_s10 = sshll.u32 %s144_s9, 4  ;;  %s15_s10 = int_to_ptr.vmem [resolvable:$true] %s14_s10 }
   0x3   :  { %s108_s11 = scalar_lea.vmem %s15_s10, 512  ;;  %p113_p1 = scmp.lt.s32.totalorder %s15_s10, %s15_s10 }
   0x4   :  { %p109_p0 = scmp.ne.s32.totalorder %s15_s10, %s108_s11  ;;  %p114_p2 = scmp.lt.s32.totalorder %s108_s11, %s108_s11 }
   0x6   :  { %p115_p3 = por %p114_p2, %p113_p1 }
   0x8   :  { %p116_p4 = pnand %p115_p3, %p109_p0 }
   0xa   :  { %119 = shalt.err (!%p116_p4)
}
   0xb   :  { %s145_s12 = smov 128   ;;  %s146_s13 = smov 8  }
   0xc   :  { %20 = dma.hbm_to_vmem [thread:$0]  %s172_s0, 512, %s15_s10, [#allocation3], %s145_s12, %s145_s12, %s146_s13  }
   0xd   :  { %140 = dma.done.wait [#allocation3], 512  }
   0xe   :  { %141 = vsyncadd [#allocation3], 4294966784  ;;  %v26_v0 = vld [vmem:[#allocation2] sm:$0xff]  ;;  %v27_v1 = vld [vmem:[#allocation2 + $0x8] sm:$0xff]  ;;  %vm70_vm0 = vcmask 1041409   ;;  %vm73_vm1 = vcmask 1042434  }
   0xf   :  { %v28_v2 = vld [vmem:[#allocation2 + $0x10] sm:$0xff]  ;;  %v29_v3 = vld [vmem:[#allocation2 + $0x18] sm:$0xff]  ;;  %v30_v4 = vrot.slane %v26_v0, 4  ;;  %v36_v5 = vrot.slane %v27_v1, 4  ;;  %v95_v24 = vld [vmem:[%s173_s1] ss:$0 sm:$0xff] }
  0x10   :  { %v42_v6 = vrot.slane %v28_v2, 4  ;;  %v48_v7 = vrot.slane %v29_v3, 4  ;;  %s147_s17 = smov [#allocation5]   ;;  %vm76_vm2 = vcmask 1043459  }
  0x11   :  { %v31_v8 = vadd.f32 %v30_v4, %v26_v0  ;;  %v37_v9 = vadd.f32 %v36_v5, %v27_v1  ;;  %s86_s18 = sshll.u32 %s147_s17, 4  ;;  %s87_s18 = int_to_ptr.vmem [resolvable:$true] %s86_s18 }
  0x12   :  { %v43_v10 = vadd.f32 %v42_v6, %v28_v2  ;;  %v49_v11 = vadd.f32 %v48_v7, %v29_v3  ;;  %s120_s1 = scalar_lea.vmem %s87_s18, 64  ;;  %p125_p6 = scmp.lt.s32.totalorder %s87_s18, %s87_s18 }
  0x13   :  { %v32_v12 = vrot.slane %v31_v8, 2  ;;  %v38_v13 = vrot.slane %v37_v9, 2  ;;  %p121_p5 = scmp.ne.s32.totalorder %s87_s18, %s120_s1  ;;  %p126_p7 = scmp.lt.s32.totalorder %s120_s1, %s120_s1 }
  0x14   :  { %v44_v14 = vrot.slane %v43_v10, 2  ;;  %v50_v15 = vrot.slane %v49_v11, 2 }
  0x15   :  { %v33_v16 = vadd.f32 %v32_v12, %v31_v8  ;;  %v39_v17 = vadd.f32 %v38_v13, %v37_v9  ;;  %p127_p8 = por %p126_p7, %p125_p6 }
  0x16   :  { %v45_v18 = vadd.f32 %v44_v14, %v43_v10  ;;  %v51_v19 = vadd.f32 %v50_v15, %v49_v11 }
  0x17   :  { %v34_v20 = vrot.slane %v33_v16, 1  ;;  %v40_v21 = vrot.slane %v39_v17, 1  ;;  %p128_p9 = pnand %p127_p8, %p121_p5 }
  0x18   :  { %v46_v22 = vrot.slane %v45_v18, 1  ;;  %v52_v23 = vrot.slane %v51_v19, 1 }
  0x19   :  { %v35_v25 = vadd.f32 %v34_v20, %v33_v16  ;;  %v41_v26 = vadd.f32 %v40_v21, %v39_v17 }
  0x1a   :  { %v47_v27 = vadd.f32 %v46_v22, %v45_v18  ;;  %v53_v28 = vadd.f32 %v52_v23, %v51_v19 }
  0x1b   :  { %v61_v29 = vmul.f32 %v95_v24, %v35_v25  ;;  %v62_v30 = vmul.f32 %v95_v24, %v41_v26 }
  0x1c   :  { %v63_v31 = vmul.f32 %v95_v24, %v47_v27  ;;  %v64_v32 = vmul.f32 %v95_v24, %v53_v28 }
  0x1d   :  { %v69_v33 = vrot.slane %v62_v30, 7 }
  0x1e   :  { %v72_v34 = vrot.slane %v63_v31, 6  ;;  %v75_v35 = vrot.slane %v64_v32, 5 }
  0x1f   :  { %v71_v36 = vsel %vm70_vm0, %v69_v33, %v61_v29 }
  0x20   :  { %v74_v37 = vsel %vm73_vm1, %v72_v34, %v71_v36 }
  0x21   :  { %v77_v38 = vsel %vm76_vm2, %v75_v35, %v74_v37 }
  0x22   :  { %79 = vst [vmem:[#allocation5] sm:$0xf] %v77_v38 }
  0x23   :  { %131 = shalt.err (!%p128_p9)
}
  0x24   :  { %89 = dma.vmem_to_hbm [thread:$0]  %s87_s18, 64, %s174_s2, [#allocation4]  }
  0x25   :  { %142 = dma.done.wait [#allocation4], 64  }
  0x26   :  { %143 = vsyncadd [#allocation4], 4294967232 }
  0x27   :  { %93 = vsyncpa [#allocation3], 1 }
  0x28   :  { %94 = vsyncpa [#allocation4], 1 }

</bundles_post_ra>
